<compile_context>
chip_gen: v5e
topology: v5e:2x2
jax: 0.10.0
libtpu: 0.0.40
codegen_flags: <defaults>
</compile_context>

<pallas_src>
import functools

import jax
import jax.numpy as jnp
from jax.experimental import pallas as pl
from jax.experimental.pallas import tpu as pltpu


def _aglu_kernel(params_ref, x_ref, o_ref, *, compute_dtype):
    # params_ref (SMEM, f32[3]) = [inv_lam, log_lam, kappa]
    inv_lam = params_ref[0].astype(compute_dtype)
    log_lam = params_ref[1].astype(compute_dtype)
    kappa = params_ref[2].astype(compute_dtype)

    x = x_ref[...].astype(compute_dtype)
    y = kappa * x - log_lam

    # Softplus with beta = -1.0 and PyTorch's threshold=20 linearization:
    #   sp = -log1p(exp(-y)) unless -y > 20, in which case sp = y.
    neg_y = -y
    sp = jnp.where(neg_y > 20.0, y, -jnp.log1p(jnp.exp(neg_y)))

    o_ref[...] = jnp.exp(sp * inv_lam).astype(o_ref.dtype)


def _vmem_limit_bytes() -> int:
    # v5e/v6e: 128 MiB physical VMEM -> allow a 64 MiB scoped limit.
    # v7x:      64 MiB physical      -> keep 32 MiB (headroom for scratch).
    try:
        cap = int(pltpu.get_tpu_info().vmem_capacity_bytes)
    except Exception:  # conservative fallback if the query is unavailable
        cap = 64 << 20
    return int(min(64 << 20, max(32 << 20, cap // 2)))


def _pack_params(lambd: jax.Array, kappa: jax.Array) -> jax.Array:
    lam = jnp.maximum(lambd.astype(jnp.float32).reshape(-1)[:1], 1e-4)
    kap = kappa.astype(jnp.float32).reshape(-1)[:1]
    return jnp.concatenate([1.0 / lam, jnp.log(lam), kap])


def _aglu_xla(x_flat: jax.Array, params: jax.Array) -> jax.Array:
    # Tiny (< 128 element) tails: not worth a kernel launch.
    inv_lam, log_lam, kappa = params[0], params[1], params[2]
    y = kappa * x_flat.astype(jnp.float32) - log_lam
    neg_y = -y
    sp = jnp.where(neg_y > 20.0, y, -jnp.log1p(jnp.exp(neg_y)))
    return jnp.exp(sp * inv_lam)


def _aglu_bulk_2d(x2d: jax.Array, params: jax.Array, *, compute_dtype) -> jax.Array:
    rows, lanes = x2d.shape
    dtype = x2d.dtype
    itemsize = jnp.dtype(dtype).itemsize
    # Sublane granule: 8 for 32-bit, 16 for 16-bit, 32 for 8-bit dtypes.
    sub = 8 if itemsize >= 4 else (16 if itemsize == 2 else 32)

    # ~4 MiB input blocks: amortizes per-grid-step overhead while keeping
    # double-buffered in+out (~16 MiB) inside the v7x-safe 32 MiB budget.
    target_block_bytes = 4 << 20
    max_br = max(sub, (target_block_bytes // (lanes * itemsize)) // sub * sub)

    bytes_total = rows * lanes * itemsize
    if bytes_total > (1 << 20) and rows >= 2 * sub:
        # Guarantee >= 2 grid steps so dimension_semantics=("parallel",) can
        # shard the work across both TensorCores on v7x.
        br = min(max_br, max(sub, (pl.cdiv(rows, 2) // sub) * sub))
    elif rows <= max_br:
        br = rows  # single full-extent block (always a legal block shape)
    else:
        br = max_br
    grid = (pl.cdiv(rows, br),)  # ragged last row-block is edge-masked by Pallas

    kernel = functools.partial(_aglu_kernel, compute_dtype=compute_dtype)
    return pl.pallas_call(
        kernel,
        out_shape=jax.ShapeDtypeStruct((rows, lanes), dtype),
        grid=grid,
        in_specs=[
            pl.BlockSpec(memory_space=pltpu.SMEM),        # params (3,) scalars
            pl.BlockSpec((br, lanes), lambda i: (i, 0)),  # x tile
        ],
        out_specs=pl.BlockSpec((br, lanes), lambda i: (i, 0)),
        compiler_params=pltpu.CompilerParams(
            dimension_semantics=("parallel",),  # megacore sharding on v7x
            vmem_limit_bytes=_vmem_limit_bytes(),
        ),
        cost_estimate=pl.CostEstimate(
            flops=3 * rows * lanes,
            transcendentals=3 * rows * lanes,   # exp, log1p, exp per element
            bytes_accessed=2 * rows * lanes * itemsize,
        ),
    )(params, x2d)


def aglu_pallas(x: jax.Array, lambd: jax.Array, kappa: jax.Array,
                *, low_precision_compute: bool = False) -> jax.Array:
    """AGLU forward: exp((1/lam) * softplus_{beta=-1}(kappa*x - log(lam))).

    `low_precision_compute=True` keeps the transcendental chain in the input
    dtype (e.g. bf16) instead of f32 — only worthwhile for bf16 I/O on v6e/v7x;
    keep False on v5e or for f32 I/O.
    """
    orig_shape = x.shape
    dtype = x.dtype
    total = x.size
    if total == 0:
        return x

    params = _pack_params(lambd, kappa)
    compute_dtype = (dtype if (low_precision_compute and dtype != jnp.float32)
                     else jnp.float32)

    flat = x.reshape(-1)

    # Lane-dense layout: widest slab width in {1024,512,256,128} dividing the
    # 128-aligned bulk.
    bulk = (total // 128) * 128
    lanes = 128
    if bulk > 0:
        for cand in (1024, 512, 256, 128):
            if bulk % cand == 0:
                lanes = cand
                break

    if bulk == total:
        # Fast path: exact reshape, no pad / slice / concat HBM traffic.
        out2d = _aglu_bulk_2d(flat.reshape(total // lanes, lanes), params,
                              compute_dtype=compute_dtype)
        return out2d.reshape(orig_shape)
    if bulk == 0:
        return _aglu_xla(flat, params).astype(dtype).reshape(orig_shape)

    # Ragged size: run the 128-divisible bulk through the kernel and the
    # < 128-element tail in plain XLA (no jnp.pad round trip).
    # TODO(synk): fuse the tail as an in-kernel masked last block (SMEM valid
    # length + iota mask) to also drop the concatenate copy.
    bulk_out = _aglu_bulk_2d(flat[:bulk].reshape(bulk // lanes, lanes), params,
                             compute_dtype=compute_dtype).reshape(-1)
    tail_out = _aglu_xla(flat[bulk:], params).astype(dtype)
    return jnp.concatenate([bulk_out, tail_out]).reshape(orig_shape)


def aglu_reference(x, lambd, kappa):
    """Pure-JAX reference matching the PyTorch module."""
    lam = jnp.maximum(lambd.astype(jnp.float32), 1e-4)
    y = kappa.astype(jnp.float32) * x.astype(jnp.float32) - jnp.log(lam)
    neg_y = -y
    sp = jnp.where(neg_y > 20.0, y, -jnp.log1p(jnp.exp(neg_y)))
    return jnp.exp(sp / lam).astype(x.dtype)


if __name__ == "__main__":
    key = jax.random.PRNGKey(0)
    k_x, k_l, k_k = jax.random.split(key, 3)

    # Small NCHW input consistent with how AGLU is used after convs.
    x = jax.random.normal(k_x, (2, 4, 16, 16), dtype=jnp.float32)

    # nn.init.uniform_ default range is U(0, 1); shapes are (1,).
    lambd = jax.random.uniform(k_l, (1,), dtype=jnp.float32)
    kappa = jax.random.uniform(k_k, (1,), dtype=jnp.float32)

    out = jax.block_until_ready(aglu_pallas(x, lambd, kappa))
    ref = aglu_reference(x, lambd, kappa)
    assert out.shape == x.shape and out.dtype == x.dtype
    assert jnp.allclose(out, ref, rtol=1e-5, atol=1e-5), "mismatch vs reference"

    # Ragged-size check: exercises the bulk-kernel + XLA-tail path (no jnp.pad).
    x_r = jax.random.normal(k_x, (3, 5, 31), dtype=jnp.float32)  # 465 elements
    out_r = jax.block_until_ready(aglu_pallas(x_r, lambd, kappa))
    ref_r = aglu_reference(x_r, lambd, kappa)
    assert out_r.shape == x_r.shape and out_r.dtype == x_r.dtype
    assert jnp.allclose(out_r, ref_r, rtol=1e-5, atol=1e-5), "mismatch (ragged)"

    print("KERNEL_OK")
</pallas_src>

<mosaic_0001>
module attributes {stable_mosaic.version = 11 : i64} {
  func.func @_aglu_kernel(%arg0: i32, %arg1: memref<3xf32, #tpu.memory_space<smem>>, %arg2: memref<2x1024xf32, #tpu.memory_space<vmem>>, %arg3: memref<2x1024xf32, #tpu.memory_space<vmem>>) attributes {dimension_semantics = [#tpu.dimension_semantics<parallel>], iteration_bounds = array<i64: 1>, scalar_prefetch = 0 : i64, scratch_operands = 0 : i64, tpu.core_type = #tpu.core_type<tc>, window_params = [{transform_indices = @transform_0, window_bounds = array<i64: 3>}, {transform_indices = @transform_1, window_bounds = array<i64: 2, 1024>}, {transform_indices = @transform_2, window_bounds = array<i64: 2, 1024>}]} {
    %c0 = arith.constant 0 : index
    %0 = memref.load %arg1[%c0] : memref<3xf32, #tpu.memory_space<smem>>
    %c1 = arith.constant 1 : index
    %1 = memref.load %arg1[%c1] : memref<3xf32, #tpu.memory_space<smem>>
    %c2 = arith.constant 2 : index
    %2 = memref.load %arg1[%c2] : memref<3xf32, #tpu.memory_space<smem>>
    %c0_0 = arith.constant 0 : index
    %c0_1 = arith.constant 0 : index
    %3 = vector.load %arg2[%c0_0, %c0_1] : memref<2x1024xf32, #tpu.memory_space<vmem>>, vector<2x1024xf32>
    %4 = vector.broadcast %2 : f32 to vector<2x1024xf32>
    %5 = arith.mulf %4, %3 : vector<2x1024xf32>
    %6 = vector.broadcast %1 : f32 to vector<2x1024xf32>
    %7 = arith.subf %5, %6 : vector<2x1024xf32>
    %cst = arith.constant 0.000000e+00 : f32
    %8 = vector.broadcast %cst : f32 to vector<2x1024xf32>
    %9 = arith.subf %8, %7 : vector<2x1024xf32>
    %cst_2 = arith.constant 2.000000e+01 : f32
    %10 = vector.broadcast %cst_2 : f32 to vector<2x1024xf32>
    %11 = arith.cmpf ogt, %9, %10 : vector<2x1024xf32>
    %12 = math.exp %9 : vector<2x1024xf32>
    %13 = math.log1p %12 : vector<2x1024xf32>
    %cst_3 = arith.constant 0.000000e+00 : f32
    %14 = vector.broadcast %cst_3 : f32 to vector<2x1024xf32>
    %15 = arith.subf %14, %13 : vector<2x1024xf32>
    %16 = arith.select %11, %7, %15 : vector<2x1024xi1>, vector<2x1024xf32>
    %17 = vector.broadcast %0 : f32 to vector<2x1024xf32>
    %18 = arith.mulf %16, %17 : vector<2x1024xf32>
    %19 = math.exp %18 : vector<2x1024xf32>
    %c0_4 = arith.constant 0 : index
    %c0_5 = arith.constant 0 : index
    %20 = vector.load %arg3[%c0_4, %c0_5] : memref<2x1024xf32, #tpu.memory_space<vmem>>, vector<2x1024xf32>
    tpu.vector_store %arg3[%c0_4, %c0_5], %19 {strides = array<i32>} : memref<2x1024xf32, #tpu.memory_space<vmem>>, vector<2x1024xf32>,
    return
  }
  func.func @transform_0(%arg0: i32) -> i32 {
    %c0_i32 = arith.constant 0 : i32
    %c0_i32_0 = arith.constant 0 : i32
    return %c0_i32 : i32
  }
  func.func @transform_1(%arg0: i32) -> (i32, i32) {
    %c0_i32 = arith.constant 0 : i32
    %c0_i32_0 = arith.constant 0 : i32
    return %arg0, %c0_i32 : i32, i32
  }
  func.func @transform_2(%arg0: i32) -> (i32, i32) {
    %c0_i32 = arith.constant 0 : i32
    %c0_i32_0 = arith.constant 0 : i32
    return %arg0, %c0_i32 : i32, i32
  }
}

</mosaic_0001>

<bundles_post_ra>
// kernel: tpu_custom_call.1
= control target key start
LH: loop header
LB: loop body
LE: loop exit
PB: predicated region body
PF: predicated region fallthrough
CT: control target
= control target key end

     0   :  { %7 = vsyncpa [#allocation5], 0  ;;  %s217_s0 = inlined_call_operand.hbm [shape: f32[3], index: 0, kind: input, shape index: {}]   ;;  %s218_s1 = inlined_call_operand.hbm [shape: f32[2,1024], index: 1, kind: input, shape index: {}]   ;;  %s219_s2 = inlined_call_operand.hbm [shape: f32[2,1024], index: 2, kind: output, shape index: {}]  }
   0x1   :  { %8 = vsyncpa [#allocation3], 0 }
   0x2   :  { %9 = vsyncpa [#allocation4], 0  ;;  %s15_s11 = sshll.u32 %s217_s0, 4  ;;  %s24_s14 = sshll.u32 %s218_s1, 4  ;;  %s16_s11 = int_to_ptr.hbm [resolvable:$true] %s15_s11  ;;  %s25_s14 = int_to_ptr.hbm [resolvable:$true] %s24_s14 }
   0x3   :  { %s190_s15 = smov [#allocation2]   ;;  %s191_s16 = smov [#allocation6]  }
   0x4   :  { %18 = dma.hbm_to_smem %s16_s11, 16, %s190_s15, [#allocation5]  }
   0x5   :  { %s26_s17 = sshll.u32 %s191_s16, 4  ;;  %s27_s17 = int_to_ptr.vmem [resolvable:$true] %s26_s17 }
   0x6   :  { %29 = dma.hbm_to_vmem [thread:$0]  %s25_s14, 256, %s27_s17, [#allocation3]  }
   0x7   :  { %184 = dma.done.wait [#allocation5], 16  }
   0x8   :  { %185 = vsyncadd [#allocation5], 4294967280 }
   0x9   :  { %186 = dma.done.wait [#allocation3], 256  }
   0xa   :  { %187 = vsyncadd [#allocation3], 4294967040 }
   0xb   :  { %38 = sfence }
   0xc   :  { %s107_s18 = sld [smem:[#allocation2 + $0x1]]  ;;  %v42_v0 = vld [vmem:[#allocation6] sm:$0xff]  ;;  %v43_v1 = vld [vmem:[#allocation6 + $0x8] sm:$0xff]  ;;  %s192_s1 = smov [#allocation7]  }
   0xd   :  { %s108_s19 = sld [smem:[#allocation2 + $0x2]]  ;;  %s94_s20 = sshll.u32 %s192_s1, 4  ;;  %s95_s20 = int_to_ptr.vmem [resolvable:$true] %s94_s20 }
   0xe   :  { %s39_s0 = sld [smem:[#allocation2]]  ;;  %s96_s23 = sshll.u32 %s219_s2, 4  ;;  %s97_s23 = int_to_ptr.hbm [resolvable:$true] %s96_s23 }
  0x12   :  { %v47_v3 = vstv %s107_s18 }
  0x13   :  { %v44_v2 = vstv %s108_s19 }
  0x14   :  { %v45_v4 = vmul.f32 %v44_v2, %v42_v0  ;;  %v46_v5 = vmul.f32 %v44_v2, %v43_v1  ;;  %v80_v30 = vstv %s39_s0 }
  0x16   :  { %v48_v6 = vsub.f32 %v45_v4, %v47_v3  ;;  %v49_v7 = vsub.f32 %v46_v5, %v47_v3 }
  0x18   :  { %v50_v8 = vsub.f32 0.0, %v48_v6  ;;  %v51_v9 = vsub.f32 0.0, %v49_v7 }
  0x1a   :  { %v54_v10 = vmul.f32 1.442695, %v50_v8  ;;  %v56_v11 = vmul.f32 1.442695, %v51_v9  ;;  %vm52_vm2 = vcmp.gt.f32.partialorder %v50_v8, 20.0  ;;  %vm53_vm3 = vcmp.gt.f32.partialorder %v51_v9, 20.0 }
  0x1c   :  { %112 = vpow2.f32 %v54_v10 }
  0x1d   :  { %114 = vpow2.f32 %v56_v11 }
  0x22   :  { %v113_v12 = vpop.eup %112 }
  0x23   :  { %v115_v13 = vpop.eup %114  ;;  %v58_v14 = vadd.f32 1.0, %v113_v12  ;;  %v61_v15 = vmul.f32 -0.5, %v113_v12  ;;  %v64_v19 = vand.u32 2147483647, %v113_v12 }
  0x24   :  { %v67_v16 = vadd.f32 1.0, %v115_v13  ;;  %v70_v17 = vmul.f32 -0.5, %v115_v13  ;;  %v73_v21 = vand.u32 2147483647, %v115_v13 }
  0x25   :  { %116 = vlog2.f32 %v58_v14  ;;  %v62_v18 = vadd.f32 1.0, %v61_v15  ;;  %vm65_vm0 = vcmp.lt.f32.partialorder %v64_v19, 0.0004427343 }
  0x26   :  { %118 = vlog2.f32 %v67_v16  ;;  %v71_v20 = vadd.f32 1.0, %v70_v17  ;;  %vm74_vm1 = vcmp.lt.f32.partialorder %v73_v21, 0.0004427343 }
  0x27   :  { %v63_v22 = vmul.f32 %v113_v12, %v62_v18 }
  0x28   :  { %v72_v24 = vmul.f32 %v115_v13, %v71_v20 }
  0x2b   :  { %v117_v23 = vpop.eup %116 }
  0x2c   :  { %v119_v25 = vpop.eup %118  ;;  %v60_v26 = vmul.f32 0.6931472, %v117_v23 }
  0x2d   :  { %v69_v27 = vmul.f32 0.6931472, %v119_v25 }
  0x2e   :  { %v66_v28 = vsel %vm65_vm0, %v63_v22, %v60_v26 }
  0x2f   :  { %v76_v29 = vsub.f32 0.0, %v66_v28  ;;  %v75_v31 = vsel %vm74_vm1, %v72_v24, %v69_v27 }
  0x30   :  { %v77_v32 = vsub.f32 0.0, %v75_v31 }
  0x31   :  { %v78_v33 = vsel %vm52_vm2, %v48_v6, %v76_v29 }
  0x32   :  { %v81_v34 = vmul.f32 %v80_v30, %v78_v33  ;;  %v79_v35 = vsel %vm53_vm3, %v49_v7, %v77_v32 }
  0x33   :  { %v82_v36 = vmul.f32 %v80_v30, %v79_v35 }
  0x34   :  { %v83_v37 = vmul.f32 1.442695, %v81_v34 }
  0x35   :  { %v85_v38 = vmul.f32 1.442695, %v82_v36 }
  0x36   :  { %120 = vpow2.f32 %v83_v37 }
  0x37   :  { %122 = vpow2.f32 %v85_v38 }
  0x3c   :  { %v121_v39 = vpop.eup %120 }
  0x3d   :  { %v123_v40 = vpop.eup %122  ;;  %87 = vst [vmem:[#allocation7] sm:$0xff] %v121_v39 }
  0x3e   :  { %88 = vst [vmem:[#allocation7 + $0x8] sm:$0xff] %v123_v40 }
  0x3f   :  { %99 = dma.vmem_to_hbm [thread:$0]  %s95_s20, 256, %s97_s23, [#allocation4]  }
  0x40   :  { %188 = dma.done.wait [#allocation4], 256  }
  0x41   :  { %189 = vsyncadd [#allocation4], 4294967040 }
  0x42   :  { %104 = vsyncpa [#allocation3], 1 }
  0x43   :  { %105 = vsyncpa [#allocation4], 1 }
  0x44   :  { %106 = vsyncpa [#allocation5], 1 }

</bundles_post_ra>
